<compile_context>
chip_gen: v7x
topology: tpu7x:2x2x1
jax: 0.10.0
libtpu: 0.0.40
codegen_flags: <defaults>
</compile_context>

<pallas_src>
import functools
import math

import jax
import jax.numpy as jnp
from jax.experimental import pallas as pl
from jax.experimental.pallas import tpu as pltpu


def _round_up(x, m):
    return ((x + m - 1) // m) * m


def _rmsnorm_kernel(x_ref, o_ref, *, d, eps):
    """Unpacked path: one (br, d) tile, per-row reduce over the lane axis.

    All math in f32 (v5e has no bf16 VPU/EUP path); only the store casts back.
    """
    x = x_ref[...].astype(jnp.float32)
    sumsq = jnp.sum(x * x, axis=-1, keepdims=True)            # (br, 1)  XLU
    rms = jnp.sqrt(sumsq) * (float(d) ** -0.5)
    inv = pl.reciprocal(rms + eps, approx=False)               # EUP + Newton
    o_ref[...] = (x * inv).astype(o_ref.dtype)


def _rmsnorm_packed_kernel(seg_ref, x_ref, o_ref, *, d, eps):
    """Lane-packed path (d | 128): each physical 128-lane row holds 128//d
    logical rows laid out contiguously along the lane axis.

    Segmented sum-of-squares + broadcast back is a single MXU matmul against
    a block-diagonal 0/1 matrix (seg_ref).  seg_ref's BlockSpec index is
    constant across the grid, so it is DMA'd once and stays resident in VMEM
    (no per-step iota/compare rebuild).
    """
    x = x_ref[...].astype(jnp.float32)
    sumsq = jnp.dot(x * x, seg_ref[...],
                    preferred_element_type=jnp.float32)        # (br, dp)
    rms = jnp.sqrt(sumsq) * (float(d) ** -0.5)
    inv = pl.reciprocal(rms + eps, approx=False)
    o_ref[...] = (x * inv).astype(o_ref.dtype)


def simple_rms_norm(x, eps=1e-8, *, target_tile_bytes=6 * 1024 * 1024):
    """Apply SimpleRMSNorm over the last axis of x (any leading shape)."""
    orig_shape = x.shape
    d = orig_shape[-1]
    rows = math.prod(orig_shape[:-1])
    if rows == 0 or d == 0:
        return x

    # Lane-dense packing for small hidden sizes (d | 128): pack 128//d logical
    # rows per physical 128-lane row so stores are unmasked full-lane vst.
    # Only when the row count divides evenly -- otherwise we would need a
    # wrapper-level pad + slice (two extra full HBM passes), which costs more
    # than the masked narrow stores of the unpacked fallback.
    pack = 1
    if d < 128 and 128 % d == 0 and rows % (128 // d) == 0:
        pack = 128 // d
    dp = d * pack
    rows_p = rows // pack

    x2 = x.reshape(rows_p, dp)   # row-major reshape: free, no copy

    itemsize = jnp.dtype(x.dtype).itemsize
    # Largest sublane-aligned row tile within the per-tile byte budget.
    # NOTE: for extremely large d (8 * d * itemsize approaching the VMEM
    # limit) a d-chunked two-pass variant would be needed; not implemented.
    br_budget = max(8, (target_tile_bytes // (dp * itemsize)) // 8 * 8)

    if rows_p <= 8:
        br = rows_p                      # single full-extent block (always legal)
    else:
        br = min(br_budget, _round_up(rows_p, 8))
        if br >= rows_p:
            # Split into >= 2 grid steps so both v7x TensorCores get work
            # under "parallel"; on single-TC v5e/v6e this costs one extra
            # ~0.35us grid step.
            br = max(8, _round_up((rows_p + 1) // 2, 8))
    grid = (pl.cdiv(rows_p, br),)
    # Ragged last block: Pallas masks the write-back, and every row is
    # normalized independently, so garbage rows in a partial block never
    # contaminate valid output rows.  Do NOT add cross-row reductions here.

    in_specs = [pl.BlockSpec((br, dp), lambda i: (i, 0))]
    operands = [x2]
    if pack > 1:
        # Block-diagonal 0/1 matrix: seg[j, k] = (j // d == k // d).
        lane = jnp.arange(dp)
        seg = (lane[:, None] // d == lane[None, :] // d).astype(jnp.float32)
        in_specs = [pl.BlockSpec((dp, dp), lambda i: (0, 0))] + in_specs
        operands = [seg] + operands
        kernel = functools.partial(_rmsnorm_packed_kernel, d=d, eps=eps)
    else:
        kernel = functools.partial(_rmsnorm_kernel, d=d, eps=eps)

    # VMEM budget: 2-deep double buffers on input and output, resident segment
    # matrix, headroom for f32 intermediates + Mosaic scratch.  Capped at the
    # smallest per-TC VMEM across generations (64 MiB on v7x).
    seg_bytes = dp * dp * 4 if pack > 1 else 0
    tile_in_bytes = br * dp * itemsize
    vmem_limit = min(
        64 * 1024 * 1024,
        4 * tile_in_bytes + 2 * seg_bytes + 2 * br * dp * 4 + 4 * 1024 * 1024,
    )

    out = pl.pallas_call(
        kernel,
        out_shape=jax.ShapeDtypeStruct((rows_p, dp), x.dtype),
        grid_spec=pltpu.PrefetchScalarGridSpec(
            num_scalar_prefetch=0,
            grid=grid,
            in_specs=in_specs,
            out_specs=pl.BlockSpec((br, dp), lambda i: (i, 0)),
        ),
        compiler_params=pltpu.CompilerParams(
            dimension_semantics=("parallel",),
            vmem_limit_bytes=vmem_limit,
        ),
    )(*operands)

    return out.reshape(orig_shape)


def _reference(x, eps=1e-8):
    d = x.shape[-1]
    xf = x.astype(jnp.float32)
    norm_x = jnp.linalg.norm(xf, axis=-1, keepdims=True)
    rms_x = norm_x * (d ** -0.5)
    return (xf / (rms_x + eps)).astype(x.dtype)


if __name__ == "__main__":
    key = jax.random.PRNGKey(0)

    # 1) Small-d lane-packed path (SimpleRMSNorm(32)): batch=2, seq=8, hidden=32
    x = jax.random.normal(key, (2, 8, 32), dtype=jnp.float32)
    y = jax.block_until_ready(simple_rms_norm(x, eps=1e-8))
    y_ref = _reference(x, eps=1e-8)
    assert y.shape == x.shape and y.dtype == x.dtype
    assert jnp.allclose(y, y_ref, atol=1e-5, rtol=1e-5)

    # 2) Wide-d path with a ragged row count (partial last block, no padding)
    x2 = jax.random.normal(jax.random.PRNGKey(1), (3, 5, 256), dtype=jnp.float32)
    y2 = jax.block_until_ready(simple_rms_norm(x2, eps=1e-8))
    y2_ref = _reference(x2, eps=1e-8)
    assert y2.shape == x2.shape and y2.dtype == x2.dtype
    assert jnp.allclose(y2, y2_ref, atol=1e-5, rtol=1e-5)

    # 3) Small-d but rows not divisible by the pack factor -> unpacked fallback
    x3 = jax.random.normal(jax.random.PRNGKey(2), (3, 5, 32), dtype=jnp.float32)
    y3 = jax.block_until_ready(simple_rms_norm(x3, eps=1e-8))
    y3_ref = _reference(x3, eps=1e-8)
    assert y3.shape == x3.shape and y3.dtype == x3.dtype
    assert jnp.allclose(y3, y3_ref, atol=1e-5, rtol=1e-5)

    print("KERNEL_OK")
</pallas_src>

<mosaic_0001>
module attributes {stable_mosaic.version = 11 : i64} {
  func.func @_rmsnorm_packed_kernel(%arg0: i32, %arg1: memref<128x128xf32, #tpu.memory_space<vmem>>, %arg2: memref<4x128xf32, #tpu.memory_space<vmem>>, %arg3: memref<4x128xf32, #tpu.memory_space<vmem>>) attributes {dimension_semantics = [#tpu.dimension_semantics<parallel>], iteration_bounds = array<i64: 1>, scalar_prefetch = 0 : i64, scratch_operands = 0 : i64, tpu.core_type = #tpu.core_type<tc>, window_params = [{pipeline_mode = #tpu.pipeline_mode<synchronous>, transform_indices = @transform_0, window_bounds = array<i64: 128, 128>}, {transform_indices = @transform_1, window_bounds = array<i64: 4, 128>}, {transform_indices = @transform_2, window_bounds = array<i64: 4, 128>}]} {
    %c0 = arith.constant 0 : index
    %c0_0 = arith.constant 0 : index
    %0 = vector.load %arg2[%c0, %c0_0] : memref<4x128xf32, #tpu.memory_space<vmem>>, vector<4x128xf32>
    %1 = arith.mulf %0, %0 : vector<4x128xf32>
    %c0_1 = arith.constant 0 : index
    %c0_2 = arith.constant 0 : index
    %2 = vector.load %arg1[%c0_1, %c0_2] : memref<128x128xf32, #tpu.memory_space<vmem>>, vector<128x128xf32>
    %cst = arith.constant dense<0.000000e+00> : vector<4x128xf32>
    %3 = tpu.matmul %1, %2, %cst {dimension_numbers = #tpu.dot_dimension_numbers<[1], [0], [0], [1], [0, 0, 1, 1], [], []>} : vector<4x128xf32>, vector<128x128xf32>, vector<4x128xf32> -> vector<4x128xf32>
    %4 = math.sqrt %3 : vector<4x128xf32>
    %cst_3 = arith.constant 0.176776692 : f32
    %5 = vector.broadcast %cst_3 : f32 to vector<4x128xf32>
    %6 = arith.mulf %4, %5 : vector<4x128xf32>
    %cst_4 = arith.constant 9.99999993E-9 : f32
    %7 = vector.broadcast %cst_4 : f32 to vector<4x128xf32>
    %8 = arith.addf %6, %7 : vector<4x128xf32>
    %9 = tpu.reciprocal %8 : vector<4x128xf32> -> vector<4x128xf32>
    %10 = arith.mulf %0, %9 : vector<4x128xf32>
    %c0_5 = arith.constant 0 : index
    %c0_6 = arith.constant 0 : index
    %11 = vector.load %arg3[%c0_5, %c0_6] : memref<4x128xf32, #tpu.memory_space<vmem>>, vector<4x128xf32>
    tpu.vector_store %arg3[%c0_5, %c0_6], %10 {strides = array<i32>} : memref<4x128xf32, #tpu.memory_space<vmem>>, vector<4x128xf32>,
    return
  }
  func.func @transform_0(%arg0: i32) -> (i32, i32) {
    %c0_i32 = arith.constant 0 : i32
    %c0_i32_0 = arith.constant 0 : i32
    %c0_i32_1 = arith.constant 0 : i32
    return %c0_i32, %c0_i32_0 : i32, i32
  }
  func.func @transform_1(%arg0: i32) -> (i32, i32) {
    %c0_i32 = arith.constant 0 : i32
    %c0_i32_0 = arith.constant 0 : i32
    return %arg0, %c0_i32 : i32, i32
  }
  func.func @transform_2(%arg0: i32) -> (i32, i32) {
    %c0_i32 = arith.constant 0 : i32
    %c0_i32_0 = arith.constant 0 : i32
    return %arg0, %c0_i32 : i32, i32
  }
}

</mosaic_0001>

<bundles_post_ra>
// kernel: tpu_custom_call.1
= control target key start
LH: loop header
LB: loop body
LE: loop exit
PB: predicated region body
PF: predicated region fallthrough
CT: control target
= control target key end

     0   :  { %7 = vsyncpa [#allocation3], 0  ;;  %s373_s0 = inlined_call_operand.hbm [shape: f32[128,128], index: 0, kind: input, shape index: {}]   ;;  %s374_s1 = inlined_call_operand.hbm [shape: f32[4,128], index: 1, kind: input, shape index: {}]   ;;  %s375_s2 = inlined_call_operand.hbm [shape: f32[4,128], index: 2, kind: output, shape index: {}]  }
   0x1   :  { %8 = vsyncpa [#allocation6], 0 }
   0x2   :  { %9 = vsyncpa [#allocation4], 0  ;;  %s314_s9 = smov [#allocation2]   ;;  %s242_s13 = scalar_lea.hbm %s373_s0, 2048 }
   0x3   :  { %s15_s10 = sshll.u32 %s314_s9, 4  ;;  %p243_p0 = scmp.ne.s32.totalorder %s373_s0, %s242_s13  ;;  %s16_s10 = int_to_ptr.vmem [resolvable:$true] %s15_s10 }
   0x4   :  { %p246_p1 = scmp.lt.u32.totalorder %s242_s13, %s373_s0 }
   0x6   :  { %p248_p2 = pnand %p246_p1, %p243_p0 }
   0x8   :  { %251 = shalt.err (!%p248_p2)
}
   0x9   :  { %s252_s18 = scalar_lea.vmem %s16_s10, 2048  ;;  %p257_p4 = scmp.lt.s32.totalorder %s16_s10, %s16_s10 }
   0xa   :  { %p253_p3 = scmp.ne.s32.totalorder %s16_s10, %s252_s18  ;;  %p258_p5 = scmp.lt.s32.totalorder %s252_s18, %s252_s18 }
   0xc   :  { %p259_p6 = por %p258_p5, %p257_p4 }
   0xe   :  { %p260_p7 = pnand %p259_p6, %p253_p3 }
  0x10   :  { %263 = shalt.err (!%p260_p7)
}
  0x11   :  { %s315_s19 = smov 128   ;;  %s316_s20 = smov 8  }
  0x12   :  { %21 = dma.hbm_to_vmem [thread:$0]  %s373_s0, 2048, %s16_s10, [#allocation3], %s315_s19, %s315_s19, %s316_s20  }
  0x13   :  { %s317_s23 = smov [#allocation5]   ;;  %s264_s27 = scalar_lea.hbm %s374_s1, 64 }
  0x14   :  { %s28_s24 = sshll.u32 %s317_s23, 4  ;;  %p265_p8 = scmp.ne.s32.totalorder %s374_s1, %s264_s27  ;;  %s29_s24 = int_to_ptr.vmem [resolvable:$true] %s28_s24 }
  0x15   :  { %p268_p9 = scmp.lt.u32.totalorder %s264_s27, %s374_s1 }
  0x17   :  { %p270_p10 = pnand %p268_p9, %p265_p8 }
  0x19   :  { %273 = shalt.err (!%p270_p10)
}
  0x1a   :  { %s274_s4 = scalar_lea.vmem %s29_s24, 64  ;;  %p279_p12 = scmp.lt.s32.totalorder %s29_s24, %s29_s24 }
  0x1b   :  { %p275_p11 = scmp.ne.s32.totalorder %s29_s24, %s274_s4  ;;  %p280_p13 = scmp.lt.s32.totalorder %s274_s4, %s274_s4 }
  0x1d   :  { %p281_p0 = por %p280_p13, %p279_p12 }
  0x1f   :  { %p282_p1 = pnand %p281_p0, %p275_p11 }
  0x21   :  { %285 = shalt.err (!%p282_p1)
}
  0x22   :  { %31 = dma.hbm_to_vmem [thread:$0]  %s374_s1, 64, %s29_s24, [#allocation6]  }
  0x23   :  { %308 = dma.done.wait [#allocation3], 2048  }
  0x24   :  { %309 = vsyncadd [#allocation3], 4294965248 }
  0x25   :  { %310 = dma.done.wait [#allocation6], 64  }
  0x26   :  { %311 = vsyncadd [#allocation6], 4294967232  ;;  %v318_v0 = vmov 0.0|0.0   ;;  %vm319_vm0 = vmmov 0   ;;  %v320_v1 = vmov 0.0   ;;  %v40_v2 = vld [vmem:[#allocation2] sm:$0xff] }
  0x27   :  { %206 = vmatprep.subr.bf16.mxu0 %v318_v0  ;;  %203 = vmatprep.mubr.msk.f32.mxu0 %vm319_vm0, %v320_v1  ;;  %v41_v3 = vld [vmem:[#allocation2 + $0x8] sm:$0xff]  ;;  %v42_v4 = vld [vmem:[#allocation2 + $0x10] sm:$0xff]  ;;  %v43_v6 = vld [vmem:[#allocation2 + $0x18] sm:$0xff]  ;;  %s321_s1 = smov [#allocation7]  }
  0x28   :  { %v207_v5 = vpack.c.bf16 %v41_v3, %v40_v2  ;;  %v210_v7 = vpack.c.bf16 %v43_v6, %v42_v4  ;;  %v44_v8 = vld [vmem:[#allocation2 + $0x20] sm:$0xff]  ;;  %v45_v9 = vld [vmem:[#allocation2 + $0x28] sm:$0xff]  ;;  %v46_v11 = vld [vmem:[#allocation2 + $0x30] sm:$0xff]  ;;  %s144_s6 = sshll.u32 %s321_s1, 4  ;;  %s145_s6 = int_to_ptr.vmem [resolvable:$true] %s144_s6 }
  0x29   :  { %v213_v10 = vpack.c.bf16 %v45_v9, %v44_v8  ;;  %v47_v12 = vld [vmem:[#allocation2 + $0x38] sm:$0xff]  ;;  %v48_v14 = vld [vmem:[#allocation2 + $0x40] sm:$0xff]  ;;  %v49_v15 = vld [vmem:[#allocation2 + $0x48] sm:$0xff]  ;;  %s286_s7 = scalar_lea.vmem %s145_s6, 64  ;;  %p291_p3 = scmp.lt.s32.totalorder %s145_s6, %s145_s6 }
  0x2a   :  { %208 = vmatpush3.bf16.msra.mxu0 %v207_v5  ;;  %v216_v13 = vpack.c.bf16 %v47_v12, %v46_v11  ;;  %v219_v16 = vpack.c.bf16 %v49_v15, %v48_v14  ;;  %v50_v17 = vld [vmem:[#allocation2 + $0x50] sm:$0xff]  ;;  %v51_v18 = vld [vmem:[#allocation2 + $0x58] sm:$0xff]  ;;  %v52_v20 = vld [vmem:[#allocation2 + $0x60] sm:$0xff]  ;;  %p287_p2 = scmp.ne.s32.totalorder %s145_s6, %s286_s7  ;;  %p292_p4 = scmp.lt.s32.totalorder %s286_s7, %s286_s7 }
  0x2b   :  { %209 = vmatprep.subr.bf16.mxu0 %v318_v0  ;;  %v222_v19 = vpack.c.bf16 %v51_v18, %v50_v17  ;;  %v53_v21 = vld [vmem:[#allocation2 + $0x68] sm:$0xff]  ;;  %v54_v23 = vld [vmem:[#allocation2 + $0x70] sm:$0xff]  ;;  %v55_v24 = vld [vmem:[#allocation2 + $0x78] sm:$0xff] }
  0x2c   :  { %v225_v22 = vpack.c.bf16 %v53_v21, %v52_v20  ;;  %v228_v25 = vpack.c.bf16 %v55_v24, %v54_v23  ;;  %v38_v26 = vld [vmem:[#allocation5] sm:$0xf]  ;;  %p293_p5 = por %p292_p4, %p291_p3 }
  0x2d   :  { %v39_v27 = vmul.f32 %v38_v26, %v38_v26 }
  0x2e   :  { %211 = vmatpush3.bf16.msra.mxu0 %v210_v7  ;;  %p294_p6 = pnand %p293_p5, %p287_p2 }
  0x2f   :  { %212 = vmatprep.subr.bf16.mxu0 %v318_v0 }
  0x32   :  { %214 = vmatpush3.bf16.msra.mxu0 %v213_v10 }
  0x33   :  { %215 = vmatprep.subr.bf16.mxu0 %v318_v0 }
  0x36   :  { %217 = vmatpush3.bf16.msra.mxu0 %v216_v13 }
  0x37   :  { %218 = vmatprep.subr.bf16.mxu0 %v318_v0 }
  0x3a   :  { %220 = vmatpush3.bf16.msra.mxu0 %v219_v16 }
  0x3b   :  { %221 = vmatprep.subr.bf16.mxu0 %v318_v0 }
  0x3e   :  { %223 = vmatpush3.bf16.msra.mxu0 %v222_v19 }
  0x3f   :  { %224 = vmatprep.subr.bf16.mxu0 %v318_v0 }
  0x42   :  { %226 = vmatpush3.bf16.msra.mxu0 %v225_v22 }
  0x43   :  { %227 = vmatprep.subr.bf16.mxu0 %v318_v0 }
  0x46   :  { %229 = vmatpush3.bf16.msra.mxu0 %v228_v25 }
  0x49   :  { %204 = vmatmul.mubr.f32.vlgmr.msra.gmra.mrb[0].mxu0 %v39_v27 }
 0x11c   :  { %v122_v28 = vpop.f32.mrb[0].mxu0 }
 0x11d   :  { %238 = vrsqrt.f32 %v122_v28  ;;  %v205_v29 = vpop.f32.mrb[1].mxu0  ;;  %vm128_vm1 = vcmp.eq.f32.partialorder %v122_v28, inf  ;;  %v131_v32 = vand.u32 2147483648, %v122_v28  ;;  %vm130_vm2 = vcmp.eq.f32.partialorder %v122_v28, 0.0 }
 0x127   :  { %v239_v30 = vpop.eup %238 }
 0x128   :  { %v127_v31 = vmul.f32 %v239_v30, %v122_v28 }
 0x12a   :  { %v129_v33 = vsel %vm128_vm1, %v122_v28, %v127_v31 }
 0x12b   :  { %v132_v34 = vsel %vm130_vm2, %v131_v32, %v129_v33 }
 0x12c   :  { %v133_v35 = vmul.f32 0.17677669, %v132_v34 }
 0x12e   :  { %v134_v36 = vadd.f32 1e-08, %v133_v35 }
 0x130   :  { %240 = vrcp.f32 %v134_v36 }
 0x13a   :  { %v241_v37 = vpop.eup %240 }
 0x13b   :  { %v136_v38 = vmul.f32 %v241_v37, %v38_v26 }
 0x13d   :  { %137 = vst [vmem:[#allocation7] sm:$0xf] %v136_v38 }
 0x13e   :  { %297 = shalt.err (!%p294_p6)
}
 0x13f   :  { %s298_s10 = scalar_lea.hbm %s375_s2, 64 }
 0x140   :  { %p299_p7 = scmp.ne.s32.totalorder %s375_s2, %s298_s10  ;;  %p302_p8 = scmp.lt.u32.totalorder %s298_s10, %s375_s2 }
 0x142   :  { %p304_p9 = pnand %p302_p8, %p299_p7 }
 0x144   :  { %307 = shalt.err (!%p304_p9)
}
 0x145   :  { %147 = dma.vmem_to_hbm [thread:$0]  %s145_s6, 64, %s375_s2, [#allocation4]  }
 0x146   :  { %312 = dma.done.wait [#allocation4], 64  }
 0x147   :  { %313 = vsyncadd [#allocation4], 4294967232 }
 0x148   :  { %151 = vsyncpa [#allocation3], 1 }
 0x149   :  { %152 = vsyncpa [#allocation6], 1 }
 0x14a   :  { %153 = vsyncpa [#allocation4], 1 }

</bundles_post_ra>
